<compile_context>
chip_gen: v5e
topology: v5e:2x2
jax: 0.10.0
libtpu: 0.0.40
codegen_flags: <defaults>
</compile_context>

<pallas_src>
import jax
import jax.numpy as jnp
from jax.experimental import pallas as pl
from jax.experimental.pallas import tpu as pltpu


def decoder_kernel(zT_ref, w4T_ref, b4_ref, w5T_ref, b5_ref, o_ref):
    # First linear, feature-major: (q, p) @ (p, tile_n) -> (q, tile_n), f32 acc.
    hT = jnp.dot(w4T_ref[...], zT_ref[...], preferred_element_type=jnp.float32)
    hT = jnp.maximum(hT + b4_ref[...], 0.0)       # b4: (q, 1) broadcasts over lanes
    # Second linear stays lane-dense on the MXU: (1, q) @ (q, tile_n) -> (1, tile_n).
    outT = jnp.dot(w5T_ref[...], hT, preferred_element_type=jnp.float32)
    o_ref[...] = outT + b5_ref[...]               # b5: (1, 1)


def _pick_tile_n(n_padded, p, itemsize):
    # Largest lane-dense tile whose double-buffered zT slab stays well inside
    # v7x's 64 MiB VMEM (v5e/v6e have 128 MiB, so this is conservative there):
    # ~8 MiB per zT buffer -> 16 MiB double-buffered + small out/weight tiles.
    cap = max(128, ((8 * 1024 * 1024) // (p * itemsize)) // 128 * 128)
    return int(min(n_padded, cap))


def decoder_forward_pallas(z, w4, b4, w5, b5, *, tile_n=None,
                           compute_dtype=jnp.float32):
    """z: (N, p); w4: (p, q); b4: (q,); w5: (q, 1); b5: (1,).  Returns (N, 1) f32.

    compute_dtype=jnp.bfloat16 halves HBM traffic on the z stream (f32
    accumulation is kept); re-validate accuracy vs the f64 torch reference
    before enabling it.
    """
    N, p = z.shape
    q = w4.shape[1]
    itemsize = jnp.dtype(compute_dtype).itemsize

    if tile_n is None:
        n128 = ((N + 127) // 128) * 128
        tile_n = _pick_tile_n(n128, p, itemsize)
    assert tile_n % 128 == 0, "tile_n must be a multiple of 128 (lane width)"

    # Ragged batch handling: pad N up to a tile multiple (padded columns compute
    # junk that is sliced off; rows are independent so no masking is needed).
    n_pad = pl.cdiv(N, tile_n) * tile_n

    # Feature-major operands (layout plumbing in plain JAX).
    zT = jnp.zeros((p, n_pad), compute_dtype).at[:, :N].set(
        z.T.astype(compute_dtype))
    w4T = w4.T.astype(compute_dtype)               # (q, p)
    b4c = b4.reshape(q, 1).astype(jnp.float32)     # (q, 1)
    w5T = w5.T.astype(jnp.float32)                 # (1, q)
    b5c = b5.reshape(1, 1).astype(jnp.float32)     # (1, 1)

    grid = (n_pad // tile_n,)

    # Roofline hint for XLA scheduling around the custom call.
    cost = pl.CostEstimate(
        flops=2 * N * q * (p + 1),
        transcendentals=0,
        bytes_accessed=N * p * itemsize + N * 4 + (p * q + 2 * q + 1) * 4,
    )

    # VMEM budget: double-buffered zT tile + sublane-padded output tile +
    # f32 hidden intermediate + weights, with headroom.  Set explicitly so big
    # tiles don't trip v5e's 16 MiB scoped default; capped below v7x physical.
    vmem_need = (2 * p * tile_n * itemsize        # zT double buffer
                 + 2 * 8 * tile_n * 4             # (1, tile_n) out, 8-sublane pad
                 + q * tile_n * 4                 # hT intermediate
                 + (1 << 20))                     # weights/biases + slack
    vmem_limit = int(min(max(int(vmem_need * 1.25), 16 * 1024 * 1024),
                         48 * 1024 * 1024))

    outT = pl.pallas_call(
        decoder_kernel,
        out_shape=jax.ShapeDtypeStruct((1, n_pad), jnp.float32),
        grid_spec=pltpu.PrefetchScalarGridSpec(
            num_scalar_prefetch=0,
            grid=grid,
            in_specs=[
                pl.BlockSpec((p, tile_n), lambda i: (0, i)),   # zT tile (lane-dense)
                pl.BlockSpec((q, p), lambda i: (0, 0)),        # w4T (resident)
                pl.BlockSpec((q, 1), lambda i: (0, 0)),        # b4
                pl.BlockSpec((1, q), lambda i: (0, 0)),        # w5T
                pl.BlockSpec((1, 1), lambda i: (0, 0)),        # b5
            ],
            out_specs=pl.BlockSpec((1, tile_n), lambda i: (0, i)),  # lane-dense out
        ),
        compiler_params=pltpu.CompilerParams(
            # Batch axis is embarrassingly parallel -> shards across v7x's 2 TCs,
            # near-neutral on v5e/v6e.
            dimension_semantics=("parallel",),
            vmem_limit_bytes=vmem_limit,
        ),
        cost_estimate=cost,
    )(zT, w4T, b4c, w5T, b5c)

    return outT[0, :N].reshape(N, 1)


def decoder_forward(z, w4, b4, w5, b5, *, min_pallas_rows=4096, **kw):
    """Dispatch: tiny batches are cheaper fused into surrounding XLA than a
    pallas_call launch + HBM round-trip; large batches take the Pallas path."""
    if z.shape[0] < min_pallas_rows:
        h = jnp.maximum(z.astype(jnp.float32) @ w4 + b4[None, :], 0.0)
        return h @ w5 + b5[None, :]
    return decoder_forward_pallas(z, w4, b4, w5, b5, **kw)


if __name__ == "__main__":
    # Small shapes consistent with the module: batch N=8, p=32, q=16.
    N, p, q = 8, 32, 16

    key = jax.random.PRNGKey(0)
    k_z, k_w4, k_b4, k_w5, k_b5 = jax.random.split(key, 5)

    z = jax.random.normal(k_z, (N, p), dtype=jnp.float32)

    # Deterministic parameter init (torch Linear-like uniform bounds).
    bound4 = 1.0 / float(jnp.sqrt(p))
    w4 = jax.random.uniform(k_w4, (p, q), jnp.float32, -bound4, bound4)
    b4 = jax.random.uniform(k_b4, (q,), jnp.float32, -bound4, bound4)
    bound5 = 1.0 / float(jnp.sqrt(q))
    w5 = jax.random.uniform(k_w5, (q, 1), jnp.float32, -bound5, bound5)
    b5 = jax.random.uniform(k_b5, (1,), jnp.float32, -bound5, bound5)

    # Exercise the Pallas path directly (production dispatch would fall back to
    # fused XLA at this tiny batch size).
    out = decoder_forward_pallas(z, w4, b4, w5, b5)
    out = jax.block_until_ready(out)

    # Correctness check against plain-JAX reference.
    ref = jnp.maximum(z @ w4 + b4[None, :], 0.0) @ w5 + b5[None, :]
    assert out.shape == (N, 1)
    assert jnp.allclose(out, ref, atol=1e-5, rtol=1e-5)

    print("KERNEL_OK")
</pallas_src>

<mosaic_0001>
module attributes {stable_mosaic.version = 11 : i64} {
  func.func @decoder_kernel(%arg0: i32, %arg1: memref<32x128xf32, #tpu.memory_space<vmem>>, %arg2: memref<16x32xf32, #tpu.memory_space<vmem>>, %arg3: memref<16x1xf32, #tpu.memory_space<vmem>>, %arg4: memref<1x16xf32, #tpu.memory_space<vmem>>, %arg5: memref<1x1xf32, #tpu.memory_space<vmem>>, %arg6: memref<1x128xf32, #tpu.memory_space<vmem>>) attributes {dimension_semantics = [#tpu.dimension_semantics<parallel>], iteration_bounds = array<i64: 1>, scalar_prefetch = 0 : i64, scratch_operands = 0 : i64, tpu.core_type = #tpu.core_type<tc>, window_params = [{transform_indices = @transform_0, window_bounds = array<i64: 32, 128>}, {pipeline_mode = #tpu.pipeline_mode<synchronous>, transform_indices = @transform_1, window_bounds = array<i64: 16, 32>}, {pipeline_mode = #tpu.pipeline_mode<synchronous>, transform_indices = @transform_2, window_bounds = array<i64: 16, 1>}, {pipeline_mode = #tpu.pipeline_mode<synchronous>, transform_indices = @transform_3, window_bounds = array<i64: 1, 16>}, {pipeline_mode = #tpu.pipeline_mode<synchronous>, transform_indices = @transform_4, window_bounds = array<i64: 1, 1>}, {transform_indices = @transform_5, window_bounds = array<i64: 1, 128>}]} {
    %c0 = arith.constant 0 : index
    %c0_0 = arith.constant 0 : index
    %0 = vector.load %arg2[%c0, %c0_0] : memref<16x32xf32, #tpu.memory_space<vmem>>, vector<16x32xf32>
    %c0_1 = arith.constant 0 : index
    %c0_2 = arith.constant 0 : index
    %1 = vector.load %arg1[%c0_1, %c0_2] : memref<32x128xf32, #tpu.memory_space<vmem>>, vector<32x128xf32>
    %cst = arith.constant dense<0.000000e+00> : vector<16x128xf32>
    %2 = tpu.matmul %0, %1, %cst {dimension_numbers = #tpu.dot_dimension_numbers<[1], [0], [0], [1], [0, 0, 1, 1], [], []>} : vector<16x32xf32>, vector<32x128xf32>, vector<16x128xf32> -> vector<16x128xf32>
    %c0_3 = arith.constant 0 : index
    %c0_4 = arith.constant 0 : index
    %3 = vector.load %arg3[%c0_3, %c0_4] : memref<16x1xf32, #tpu.memory_space<vmem>>, vector<16x1xf32>
    %4 = vector.broadcast %3 : vector<16x1xf32> to vector<16x128xf32>
    %5 = arith.addf %2, %4 : vector<16x128xf32>
    %cst_5 = arith.constant 0.000000e+00 : f32
    %6 = vector.broadcast %cst_5 : f32 to vector<16x128xf32>
    %7 = arith.maximumf %5, %6 : vector<16x128xf32>
    %c0_6 = arith.constant 0 : index
    %c0_7 = arith.constant 0 : index
    %8 = vector.load %arg4[%c0_6, %c0_7] : memref<1x16xf32, #tpu.memory_space<vmem>>, vector<1x16xf32>
    %cst_8 = arith.constant dense<0.000000e+00> : vector<1x128xf32>
    %9 = tpu.matmul %8, %7, %cst_8 {dimension_numbers = #tpu.dot_dimension_numbers<[1], [0], [0], [1], [0, 0, 1, 1], [], []>} : vector<1x16xf32>, vector<16x128xf32>, vector<1x128xf32> -> vector<1x128xf32>
    %c0_9 = arith.constant 0 : index
    %c0_10 = arith.constant 0 : index
    %10 = vector.load %arg5[%c0_9, %c0_10] : memref<1x1xf32, #tpu.memory_space<vmem>>, vector<1x1xf32>
    %11 = vector.broadcast %10 : vector<1x1xf32> to vector<1x128xf32>
    %12 = arith.addf %9, %11 : vector<1x128xf32>
    %c0_11 = arith.constant 0 : index
    %c0_12 = arith.constant 0 : index
    %13 = vector.load %arg6[%c0_11, %c0_12] : memref<1x128xf32, #tpu.memory_space<vmem>>, vector<1x128xf32>
    tpu.vector_store %arg6[%c0_11, %c0_12], %12 {strides = array<i32>} : memref<1x128xf32, #tpu.memory_space<vmem>>, vector<1x128xf32>,
    return
  }
  func.func @transform_0(%arg0: i32) -> (i32, i32) {
    %c0_i32 = arith.constant 0 : i32
    %c0_i32_0 = arith.constant 0 : i32
    return %c0_i32, %arg0 : i32, i32
  }
  func.func @transform_1(%arg0: i32) -> (i32, i32) {
    %c0_i32 = arith.constant 0 : i32
    %c0_i32_0 = arith.constant 0 : i32
    %c0_i32_1 = arith.constant 0 : i32
    return %c0_i32, %c0_i32_0 : i32, i32
  }
  func.func @transform_2(%arg0: i32) -> (i32, i32) {
    %c0_i32 = arith.constant 0 : i32
    %c0_i32_0 = arith.constant 0 : i32
    %c0_i32_1 = arith.constant 0 : i32
    return %c0_i32, %c0_i32_0 : i32, i32
  }
  func.func @transform_3(%arg0: i32) -> (i32, i32) {
    %c0_i32 = arith.constant 0 : i32
    %c0_i32_0 = arith.constant 0 : i32
    %c0_i32_1 = arith.constant 0 : i32
    return %c0_i32, %c0_i32_0 : i32, i32
  }
  func.func @transform_4(%arg0: i32) -> (i32, i32) {
    %c0_i32 = arith.constant 0 : i32
    %c0_i32_0 = arith.constant 0 : i32
    %c0_i32_1 = arith.constant 0 : i32
    return %c0_i32, %c0_i32_0 : i32, i32
  }
  func.func @transform_5(%arg0: i32) -> (i32, i32) {
    %c0_i32 = arith.constant 0 : i32
    %c0_i32_0 = arith.constant 0 : i32
    return %c0_i32, %arg0 : i32, i32
  }
}

</mosaic_0001>

<bundles_post_ra>
// kernel: tpu_custom_call.1
= control target key start
LH: loop header
LB: loop body
LE: loop exit
PB: predicated region body
PF: predicated region fallthrough
CT: control target
= control target key end

     0   :  { %s264_s0 = inlined_call_operand.hbm [shape: f32[32,128], index: 0, kind: input, shape index: {}]   ;;  %s265_s1 = inlined_call_operand.vmem [shape: f32[16,32], index: 1, kind: input, shape index: {}]   ;;  %s266_s2 = inlined_call_operand.vmem [shape: f32[16,1], index: 2, kind: input, shape index: {}]   ;;  %s267_s3 = inlined_call_operand.vmem [shape: f32[1,16], index: 3, kind: input, shape index: {}]   ;;  %s268_s4 = inlined_call_operand.<no memory space> [shape: f32[1,1], index: 4, kind: input, shape index: {}]   ;;  %s269_s5 = inlined_call_operand.hbm [shape: f32[1,128], index: 5, kind: output, shape index: {}]  }
   0x1   :  { %v10_v0 = vstv %s268_s4 }
   0x2   :  { %11 = vst [vmem:[#allocation2] sm:$0x1] %v10_v0 }
   0x3   :  { %12 = vsyncpa [#allocation4], 0 }
   0x4   :  { %13 = vsyncpa [#allocation5], 0  ;;  %s18_s22 = sshll.u32 %s264_s0, 4  ;;  %s205_s23 = smov [#allocation3]   ;;  %s19_s22 = int_to_ptr.hbm [resolvable:$true] %s18_s22 }
   0x5   :  { %s20_s24 = sshll.u32 %s205_s23, 4  ;;  %s206_s25 = smov 128   ;;  %s21_s24 = int_to_ptr.vmem [resolvable:$true] %s20_s24 }
   0x6   :  { %s207_s26 = smov 8  }
   0x7   :  { %26 = dma.hbm_to_vmem [thread:$0]  %s19_s22, 512, %s21_s24, [#allocation4], %s206_s25, %s206_s25, %s207_s26  }
   0x8   :  { %201 = dma.done.wait [#allocation4], 512  }
   0x9   :  { %202 = vsyncadd [#allocation4], 4294966784  ;;  %v208_v1 = vmov 0   ;;  %v44_v2 = vld [vmem:[#allocation3 + $0x18] sm:$0xff]  ;;  %v43_v3 = vld [vmem:[#allocation3 + $0x10] sm:$0xff]  ;;  %vm57_vm0 = vcmask 261120  }
   0xa   :  { %151 = vset.pattern.permute.xlu0 %v208_v1  ;;  %152 = vset.pattern.permute.xlu1 %v208_v1  ;;  %v42_v4 = vld [vmem:[#allocation3 + $0x8] sm:$0xff]  ;;  %v41_v6 = vld [vmem:[#allocation3] sm:$0xff]  ;;  %v90_v10 = vld [vmem:[#allocation2] sm:$0x1]  ;;  %vm97_vm1 = vcmask 130048   ;;  %s129_s12 = sshll.u32 %s269_s5, 4  ;;  %s130_s12 = int_to_ptr.hbm [resolvable:$true] %s129_s12 }
   0xb   :  { %76 = vmatpush.msra.mxu0 %v44_v2  ;;  %142 = vmatpush.msra.mxu2 %v44_v2  ;;  %v46_v5 = vld [vmem:[%s266_s2 + $0x8] sm:$0xff]  ;;  %v39_v7 = vld [vmem:[%s265_s1] sm:$0xff] }
   0xc   :  { %54 = vperm.xlu0 %151, %v46_v5   ;;  %v40_v8 = vld [vmem:[%s265_s1 + $0x8] sm:$0xff]  ;;  %v45_v9 = vld [vmem:[%s266_s2] sm:$0xff]  ;;  %93 = vperm.xlu1 %152, %v90_v10   ;;  %s209_s2 = smov [#allocation6]  }
   0xd   :  { %77 = vmatpush.msra.mxu0 %v43_v3  ;;  %143 = vmatpush.msra.mxu2 %v43_v3  ;;  %v89_v19 = vld [vmem:[%s267_s3] sm:$0x1]  ;;  %s127_s9 = sshll.u32 %s209_s2, 4  ;;  %s128_s9 = int_to_ptr.vmem [resolvable:$true] %s127_s9 }
   0xf   :  { %78 = vmatpush.msra.mxu0 %v42_v4  ;;  %144 = vmatpush.msra.mxu2 %v42_v4 }
  0x11   :  { %79 = vmatpush.msra.mxu0 %v41_v6  ;;  %145 = vmatpush.msra.mxu2 %v41_v6 }
  0x12   :  { %139 = vmatmul.msk.f32.vlgmr.msra.gmra.mxu0 %vm57_vm0, %v39_v7  ;;  %140 = vmatmul.msk.f32.vlgmr.msra.gmra.mxu2 %vm57_vm0, %v40_v8 }
  0x14   :  { %49 = vperm.xlu0 %151, %v45_v9  }
  0x7e   :  { %v55_v11 = vpop.permute.xlu0 %54  ;;  %v94_v20 = vpop.permute.xlu1 %93 }
  0x7f   :  { %v96_v21 = vperm.slane %v94_v20, 0 }
  0x86   :  { %v50_v12 = vpop.permute.xlu0 %49 }
  0x8f   :  { %v81_v13 = vpop.f32.mrf.mxu0 }
  0x90   :  { %v82_v15 = vadd.f32 %v81_v13, %v50_v12 }
  0x92   :  { %v87_v18 = vmax.f32 %v82_v15, 0.0 }
  0x95   :  { %v84_v14 = vpop.f32.mrf.mxu2 }
  0x96   :  { %v85_v16 = vadd.f32 %v84_v14, %v55_v11 }
  0x98   :  { %v88_v17 = vmax.f32 %v85_v16, 0.0 }
  0x9a   :  { %115 = vmatpush.msra.mxu1 %v88_v17 }
  0x9c   :  { %116 = vmatpush.msra.mxu1 %v87_v18 }
  0x9d   :  { %141 = vmatmul.msk.f32.vlgmr.msra.gmra.mxu1 %vm97_vm1, %v89_v19 }
 0x11a   :  { %v118_v22 = vpop.f32.mrf.mxu1 }
 0x11b   :  { %v119_v23 = vadd.f32 %v118_v22, %v96_v21 }
 0x11d   :  { %121 = vst [vmem:[#allocation6] sm:$0x1] %v119_v23 }
 0x11e   :  { %132 = dma.vmem_to_hbm [thread:$0]  %s128_s9, 16, %s130_s12, [#allocation5]  }
 0x11f   :  { %203 = dma.done.wait [#allocation5], 16  }
 0x120   :  { %204 = vsyncadd [#allocation5], 4294967280 }
 0x121   :  { %137 = vsyncpa [#allocation4], 1 }
 0x122   :  { %138 = vsyncpa [#allocation5], 1 }

</bundles_post_ra>
